<compile_context>
chip_gen: v7x
topology: tpu7x:2x2x1
jax: 0.10.0
libtpu: 0.0.40
codegen_flags: <defaults>
</compile_context>

<pallas_src>
import math
import functools

import jax
import jax.numpy as jnp
from jax import lax
from jax.experimental import pallas as pl
from jax.experimental.pallas import tpu as pltpu


_INV_SQRT2 = 1.0 / math.sqrt(2.0)


def _gelu(x):
    # GELU exactly as in the reference: 0.5 * x * (1 + erf(x / sqrt(2)))
    return 0.5 * x * (1.0 + lax.erf(x * _INV_SQRT2))


def _round_up(n, m):
    return ((n + m - 1) // m) * m


def _cdiv(a, b):
    return -(-a // b)


def ffn_kernel(*refs, n_layers, use_gelu):
    """refs = (x, w0, b0, w1, b1, ..., w_{L-1}, b_{L-1}, out)."""
    x_ref = refs[0]
    out_ref = refs[-1]
    params = refs[1:-1]

    act = _gelu if use_gelu else (lambda v: jnp.maximum(v, 0.0))
    compute_dtype = x_ref.dtype

    h = x_ref[...]
    for layer in range(n_layers):
        w = params[2 * layer][...]
        b = params[2 * layer + 1][...]
        # MXU matmul in the compute dtype with f32 accumulation; bias-add and
        # activation in f32.
        y = jnp.dot(h, w, preferred_element_type=jnp.float32) + b
        if layer < n_layers - 1:
            # (dropout would go here; identity in eval mode)
            h = act(y).astype(compute_dtype)
        else:
            out_ref[...] = y.astype(out_ref.dtype)


def transformer_ffn(x2d, params, *, use_gelu, tile_m=512, lane=128):
    """x2d: (M, in_dim). params: flat list [w1, b1, (wm, bm)*, w2, b2] with
    weights in (in, out) layout and biases shaped (1, out)."""
    M, in_dim = x2d.shape
    out_dim = params[-1].shape[-1]
    n_layers = len(params) // 2
    compute_dtype = x2d.dtype

    # ---- pad feature dims to 128-lane multiples; weights in the compute dtype
    # (bf16 stays bf16 on the MXU), biases kept in f32 (added post-matmul).
    padded = []
    for li in range(n_layers):
        w, b = params[2 * li], params[2 * li + 1]
        fi, fo = w.shape
        fi_p, fo_p = _round_up(fi, lane), _round_up(fo, lane)
        w = jnp.pad(w, ((0, fi_p - fi), (0, fo_p - fo))).astype(compute_dtype)
        b = jnp.pad(b, ((0, 0), (0, fo_p - fo))).astype(jnp.float32)
        padded += [w, b]

    in_p = padded[0].shape[0]
    out_p = padded[-1].shape[-1]
    hid_p = max(p.shape[-1] for p in padded[1::2])

    # ---- choose M tile: as large as possible (fills MXU rows, amortizes the
    # per-grid-step overhead), but with >= 2 grid steps when there is enough
    # work so both v7x TensorCores get a share of the "parallel" axis.
    tile_m = min(tile_m, _round_up(M, 8))
    if M >= 2 * lane and _cdiv(M, tile_m) < 2:
        tile_m = _round_up(_cdiv(M, 2), 8)
    M_p = _round_up(M, tile_m)

    x_p = x2d
    if (M_p, in_p) != (M, in_dim):
        x_p = jnp.pad(x2d, ((0, M_p - M), (0, in_p - in_dim)))

    grid = (M_p // tile_m,)

    x_spec = pl.BlockSpec((tile_m, in_p), lambda i: (i, 0))
    out_spec = pl.BlockSpec((tile_m, out_p), lambda i: (i, 0))
    # Weights/biases: whole array resident in VMEM, loaded once and
    # single-buffered (their block never changes across the grid).
    param_specs = [
        pl.BlockSpec(memory_space=pltpu.MemorySpace.VMEM) for _ in padded
    ]

    # ---- explicit VMEM budget: double-buffered x/out tiles + resident params
    # + f32 intermediates, with 2x headroom, capped at 64 MiB (safe on all of
    # v5e / v6e / v7x).
    itemsize = jnp.dtype(compute_dtype).itemsize
    tiles_bytes = 2 * tile_m * (in_p + out_p) * itemsize      # 2x-buffered I/O
    param_bytes = sum(p.size * p.dtype.itemsize for p in padded)
    interm_bytes = 2 * tile_m * hid_p * 4                     # f32 h / y tiles
    vmem_limit = int(min(max(2 * (tiles_bytes + param_bytes + interm_bytes),
                             32 << 20), 64 << 20))

    kernel = functools.partial(ffn_kernel, n_layers=n_layers, use_gelu=use_gelu)

    out_padded = pl.pallas_call(
        kernel,
        grid=grid,
        in_specs=[x_spec] + param_specs,
        out_specs=out_spec,
        out_shape=jax.ShapeDtypeStruct((M_p, out_p), compute_dtype),
        compiler_params=pltpu.CompilerParams(
            dimension_semantics=("parallel",),
            vmem_limit_bytes=vmem_limit),
    )(x_p, *padded)

    return out_padded[:M, :out_dim]


def init_params(key, in_dim, dim_hidden, out_dim, hidden_layers):
    """Deterministic init mirroring nn.Linear shapes; weights returned in
    (in_features, out_features) layout, biases as (1, out_features)."""
    def linear(k, fan_in, fan_out):
        kw, kb = jax.random.split(k)
        bound = 1.0 / math.sqrt(fan_in)
        w = jax.random.uniform(kw, (fan_in, fan_out), jnp.float32, -bound, bound)
        b = jax.random.uniform(kb, (1, fan_out), jnp.float32, -bound, bound)
        return w, b

    keys = jax.random.split(key, hidden_layers + 1)
    params = []
    w, b = linear(keys[0], in_dim, dim_hidden)          # lin1
    params += [w, b]
    for i in range(1, hidden_layers):                   # midlin
        w, b = linear(keys[i], dim_hidden, dim_hidden)
        params += [w, b]
    w, b = linear(keys[-1], dim_hidden, out_dim)        # lin2
    params += [w, b]
    return params


def reference_ffn(x2d, params, use_gelu):
    act = _gelu if use_gelu else (lambda v: jnp.maximum(v, 0.0))
    n_mid = (len(params) - 4) // 2
    h = act(x2d @ params[0] + params[1])
    for i in range(n_mid):
        h = act(h @ params[2 + 2 * i] + params[3 + 2 * i])
    return h @ params[-2] + params[-1]


if __name__ == "__main__":
    # Module hyper-params (small synthetic config).
    in_dim, dim_hidden, out_dim = 32, 64, 32
    hidden_layers = 2          # -> one midlin layer
    use_gelu = True            # gelu_activation=True
    batch, seq = 2, 8

    key = jax.random.PRNGKey(0)
    kx, kp = jax.random.split(key)

    x = jax.random.normal(kx, (batch, seq, in_dim), jnp.float32)
    params = init_params(kp, in_dim, dim_hidden, out_dim, hidden_layers)

    x2d = x.reshape(batch * seq, in_dim)
    out2d = transformer_ffn(x2d, params, use_gelu=use_gelu)
    out = out2d.reshape(batch, seq, out_dim)
    jax.block_until_ready(out)

    ref = reference_ffn(x2d, params, use_gelu).reshape(batch, seq, out_dim)
    assert jnp.allclose(out, ref, atol=1e-4, rtol=1e-5), "mismatch vs reference"

    print("KERNEL_OK")
</pallas_src>

<mosaic_0001>
module attributes {stable_mosaic.version = 11 : i64} {
  func.func @ffn_kernel(%arg0: i32, %arg1: memref<16x128xf32, #tpu.memory_space<vmem>>, %arg2: memref<128x128xf32, #tpu.memory_space<vmem>>, %arg3: memref<1x128xf32, #tpu.memory_space<vmem>>, %arg4: memref<128x128xf32, #tpu.memory_space<vmem>>, %arg5: memref<1x128xf32, #tpu.memory_space<vmem>>, %arg6: memref<128x128xf32, #tpu.memory_space<vmem>>, %arg7: memref<1x128xf32, #tpu.memory_space<vmem>>, %arg8: memref<16x128xf32, #tpu.memory_space<vmem>>) attributes {dimension_semantics = [#tpu.dimension_semantics<parallel>], iteration_bounds = array<i64: 1>, scalar_prefetch = 0 : i64, scratch_operands = 0 : i64, tpu.core_type = #tpu.core_type<tc>, window_params = [{transform_indices = @transform_0, window_bounds = array<i64: 16, 128>}, {pipeline_mode = #tpu.pipeline_mode<synchronous>, transform_indices = @transform_1, window_bounds = array<i64: 128, 128>}, {pipeline_mode = #tpu.pipeline_mode<synchronous>, transform_indices = @transform_2, window_bounds = array<i64: 1, 128>}, {pipeline_mode = #tpu.pipeline_mode<synchronous>, transform_indices = @transform_3, window_bounds = array<i64: 128, 128>}, {pipeline_mode = #tpu.pipeline_mode<synchronous>, transform_indices = @transform_4, window_bounds = array<i64: 1, 128>}, {pipeline_mode = #tpu.pipeline_mode<synchronous>, transform_indices = @transform_5, window_bounds = array<i64: 128, 128>}, {pipeline_mode = #tpu.pipeline_mode<synchronous>, transform_indices = @transform_6, window_bounds = array<i64: 1, 128>}, {transform_indices = @transform_7, window_bounds = array<i64: 16, 128>}]} {
    %c0 = arith.constant 0 : index
    %c0_0 = arith.constant 0 : index
    %0 = vector.load %arg1[%c0, %c0_0] : memref<16x128xf32, #tpu.memory_space<vmem>>, vector<16x128xf32>
    %c0_1 = arith.constant 0 : index
    %c0_2 = arith.constant 0 : index
    %1 = vector.load %arg2[%c0_1, %c0_2] : memref<128x128xf32, #tpu.memory_space<vmem>>, vector<128x128xf32>
    %c0_3 = arith.constant 0 : index
    %c0_4 = arith.constant 0 : index
    %2 = vector.load %arg3[%c0_3, %c0_4] : memref<1x128xf32, #tpu.memory_space<vmem>>, vector<1x128xf32>
    %cst = arith.constant dense<0.000000e+00> : vector<16x128xf32>
    %3 = tpu.matmul %0, %1, %cst {dimension_numbers = #tpu.dot_dimension_numbers<[1], [0], [0], [1], [0, 0, 1, 1], [], []>} : vector<16x128xf32>, vector<128x128xf32>, vector<16x128xf32> -> vector<16x128xf32>
    %4 = vector.broadcast %2 : vector<1x128xf32> to vector<16x128xf32>
    %5 = arith.addf %3, %4 : vector<16x128xf32>
    %cst_5 = arith.constant 5.000000e-01 : f32
    %6 = vector.broadcast %cst_5 : f32 to vector<16x128xf32>
    %7 = arith.mulf %6, %5 : vector<16x128xf32>
    %cst_6 = arith.constant 0.707106769 : f32
    %8 = vector.broadcast %cst_6 : f32 to vector<16x128xf32>
    %9 = arith.mulf %5, %8 : vector<16x128xf32>
    %10 = math.erf %9 : vector<16x128xf32>
    %cst_7 = arith.constant 1.000000e+00 : f32
    %11 = vector.broadcast %cst_7 : f32 to vector<16x128xf32>
    %12 = arith.addf %11, %10 : vector<16x128xf32>
    %13 = arith.mulf %7, %12 : vector<16x128xf32>
    %c0_8 = arith.constant 0 : index
    %c0_9 = arith.constant 0 : index
    %14 = vector.load %arg4[%c0_8, %c0_9] : memref<128x128xf32, #tpu.memory_space<vmem>>, vector<128x128xf32>
    %c0_10 = arith.constant 0 : index
    %c0_11 = arith.constant 0 : index
    %15 = vector.load %arg5[%c0_10, %c0_11] : memref<1x128xf32, #tpu.memory_space<vmem>>, vector<1x128xf32>
    %cst_12 = arith.constant dense<0.000000e+00> : vector<16x128xf32>
    %16 = tpu.matmul %13, %14, %cst_12 {dimension_numbers = #tpu.dot_dimension_numbers<[1], [0], [0], [1], [0, 0, 1, 1], [], []>} : vector<16x128xf32>, vector<128x128xf32>, vector<16x128xf32> -> vector<16x128xf32>
    %17 = vector.broadcast %15 : vector<1x128xf32> to vector<16x128xf32>
    %18 = arith.addf %16, %17 : vector<16x128xf32>
    %cst_13 = arith.constant 5.000000e-01 : f32
    %19 = vector.broadcast %cst_13 : f32 to vector<16x128xf32>
    %20 = arith.mulf %19, %18 : vector<16x128xf32>
    %cst_14 = arith.constant 0.707106769 : f32
    %21 = vector.broadcast %cst_14 : f32 to vector<16x128xf32>
    %22 = arith.mulf %18, %21 : vector<16x128xf32>
    %23 = math.erf %22 : vector<16x128xf32>
    %cst_15 = arith.constant 1.000000e+00 : f32
    %24 = vector.broadcast %cst_15 : f32 to vector<16x128xf32>
    %25 = arith.addf %24, %23 : vector<16x128xf32>
    %26 = arith.mulf %20, %25 : vector<16x128xf32>
    %c0_16 = arith.constant 0 : index
    %c0_17 = arith.constant 0 : index
    %27 = vector.load %arg6[%c0_16, %c0_17] : memref<128x128xf32, #tpu.memory_space<vmem>>, vector<128x128xf32>
    %c0_18 = arith.constant 0 : index
    %c0_19 = arith.constant 0 : index
    %28 = vector.load %arg7[%c0_18, %c0_19] : memref<1x128xf32, #tpu.memory_space<vmem>>, vector<1x128xf32>
    %cst_20 = arith.constant dense<0.000000e+00> : vector<16x128xf32>
    %29 = tpu.matmul %26, %27, %cst_20 {dimension_numbers = #tpu.dot_dimension_numbers<[1], [0], [0], [1], [0, 0, 1, 1], [], []>} : vector<16x128xf32>, vector<128x128xf32>, vector<16x128xf32> -> vector<16x128xf32>
    %30 = vector.broadcast %28 : vector<1x128xf32> to vector<16x128xf32>
    %31 = arith.addf %29, %30 : vector<16x128xf32>
    %c0_21 = arith.constant 0 : index
    %c0_22 = arith.constant 0 : index
    %32 = vector.load %arg8[%c0_21, %c0_22] : memref<16x128xf32, #tpu.memory_space<vmem>>, vector<16x128xf32>
    tpu.vector_store %arg8[%c0_21, %c0_22], %31 {strides = array<i32>} : memref<16x128xf32, #tpu.memory_space<vmem>>, vector<16x128xf32>,
    return
  }
  func.func @transform_0(%arg0: i32) -> (i32, i32) {
    %c0_i32 = arith.constant 0 : i32
    %c0_i32_0 = arith.constant 0 : i32
    return %arg0, %c0_i32 : i32, i32
  }
  func.func @transform_1(%arg0: i32) -> (i32, i32) {
    %c0_i32 = arith.constant 0 : i32
    %c0_i32_0 = arith.constant 0 : i32
    %c0_i32_1 = arith.constant 0 : i32
    return %c0_i32, %c0_i32_0 : i32, i32
  }
  func.func @transform_2(%arg0: i32) -> (i32, i32) {
    %c0_i32 = arith.constant 0 : i32
    %c0_i32_0 = arith.constant 0 : i32
    %c0_i32_1 = arith.constant 0 : i32
    return %c0_i32, %c0_i32_0 : i32, i32
  }
  func.func @transform_3(%arg0: i32) -> (i32, i32) {
    %c0_i32 = arith.constant 0 : i32
    %c0_i32_0 = arith.constant 0 : i32
    %c0_i32_1 = arith.constant 0 : i32
    return %c0_i32, %c0_i32_0 : i32, i32
  }
  func.func @transform_4(%arg0: i32) -> (i32, i32) {
    %c0_i32 = arith.constant 0 : i32
    %c0_i32_0 = arith.constant 0 : i32
    %c0_i32_1 = arith.constant 0 : i32
    return %c0_i32, %c0_i32_0 : i32, i32
  }
  func.func @transform_5(%arg0: i32) -> (i32, i32) {
    %c0_i32 = arith.constant 0 : i32
    %c0_i32_0 = arith.constant 0 : i32
    %c0_i32_1 = arith.constant 0 : i32
    return %c0_i32, %c0_i32_0 : i32, i32
  }
  func.func @transform_6(%arg0: i32) -> (i32, i32) {
    %c0_i32 = arith.constant 0 : i32
    %c0_i32_0 = arith.constant 0 : i32
    %c0_i32_1 = arith.constant 0 : i32
    return %c0_i32, %c0_i32_0 : i32, i32
  }
  func.func @transform_7(%arg0: i32) -> (i32, i32) {
    %c0_i32 = arith.constant 0 : i32
    %c0_i32_0 = arith.constant 0 : i32
    return %arg0, %c0_i32 : i32, i32
  }
}

</mosaic_0001>

<bundles_post_ra>
// kernel: tpu_custom_call.1
= control target key start
LH: loop header
LB: loop body
LE: loop exit
PB: predicated region body
PF: predicated region fallthrough
CT: control target
= control target key end

     0   :  { %12 = vsyncpa [#allocation3], 0  ;;  %s955_s0 = inlined_call_operand.hbm [shape: f32[16,128], index: 0, kind: input, shape index: {}]   ;;  %s956_s1 = inlined_call_operand.hbm [shape: f32[128,128], index: 1, kind: input, shape index: {}]   ;;  %s957_s2 = inlined_call_operand.vmem [shape: f32[1,128], index: 2, kind: input, shape index: {}]   ;;  %s958_s3 = inlined_call_operand.hbm [shape: f32[128,128], index: 3, kind: input, shape index: {}]   ;;  %s959_s4 = inlined_call_operand.vmem [shape: f32[1,128], index: 4, kind: input, shape index: {}]   ;;  %s960_s5 = inlined_call_operand.hbm [shape: f32[128,128], index: 5, kind: input, shape index: {}]   ;;  %s961_s6 = inlined_call_operand.vmem [shape: f32[1,128], index: 6, kind: input, shape index: {}]   ;;  %s962_s7 = inlined_call_operand.hbm [shape: f32[16,128], index: 7, kind: output, shape index: {}]  }
   0x1   :  { %13 = vsyncpa [#allocation6], 0 }
   0x2   :  { %14 = vsyncpa [#allocation9], 0 }
   0x3   :  { %15 = vsyncpa [#allocation4], 0  ;;  %s810_s24 = smov [#allocation5]   ;;  %s811_s26 = smov [#allocation2]  }
   0x4   :  { %s33_s25 = sshll.u32 %s810_s24, 4  ;;  %s21_s27 = sshll.u32 %s811_s26, 4  ;;  %s34_s25 = int_to_ptr.vmem [resolvable:$true] %s33_s25  ;;  %s857_s27 = int_to_ptr.vmem [resolvable:$true] %s21_s27 }
   0x5   :  { %s692_s30 = scalar_lea.hbm %s956_s1, 2048 }
   0x6   :  { %p693_p0 = scmp.ne.s32.totalorder %s956_s1, %s692_s30  ;;  %p696_p1 = scmp.lt.u32.totalorder %s692_s30, %s956_s1 }
   0x8   :  { %p698_p2 = pnand %p696_p1, %p693_p0 }
   0xa   :  { %701 = shalt.err (!%p698_p2)
}
   0xb   :  { %s702_s12 = scalar_lea.vmem %s34_s25, 2048  ;;  %p707_p4 = scmp.lt.s32.totalorder %s34_s25, %s34_s25 }
   0xc   :  { %p703_p3 = scmp.ne.s32.totalorder %s34_s25, %s702_s12  ;;  %p708_p5 = scmp.lt.s32.totalorder %s702_s12, %s702_s12 }
   0xe   :  { %p709_p6 = por %p708_p5, %p707_p4 }
  0x10   :  { %p710_p7 = pnand %p709_p6, %p703_p3 }
  0x12   :  { %713 = shalt.err (!%p710_p7)
}
  0x13   :  { %s812_s13 = smov 128   ;;  %s813_s14 = smov 8  }
  0x14   :  { %39 = dma.hbm_to_vmem [thread:$0]  %s956_s1, 2048, %s34_s25, [#allocation6], %s812_s13, %s812_s13, %s813_s14  }
  0x15   :  { %s714_s19 = scalar_lea.hbm %s955_s0, 256 }
  0x16   :  { %p715_p8 = scmp.ne.s32.totalorder %s955_s0, %s714_s19  ;;  %p718_p9 = scmp.lt.u32.totalorder %s714_s19, %s955_s0 }
  0x18   :  { %p720_p10 = pnand %p718_p9, %p715_p8 }
  0x1a   :  { %723 = shalt.err (!%p720_p10)
}
  0x1b   :  { %s724_s24 = scalar_lea.vmem %s857_s27, 256  ;;  %p729_p12 = scmp.lt.s32.totalorder %s857_s27, %s857_s27 }
  0x1c   :  { %p725_p11 = scmp.ne.s32.totalorder %s857_s27, %s724_s24  ;;  %p730_p13 = scmp.lt.s32.totalorder %s724_s24, %s724_s24 }
  0x1e   :  { %p731_p0 = por %p730_p13, %p729_p12 }
  0x20   :  { %p732_p1 = pnand %p731_p0, %p725_p11 }
  0x22   :  { %735 = shalt.err (!%p732_p1)
}
  0x23   :  { %27 = dma.hbm_to_vmem [thread:$0]  %s955_s0, 256, %s857_s27, [#allocation3], %s812_s13, %s812_s13, %s813_s14  }
  0x24   :  { %s814_s26 = smov [#allocation7]   ;;  %s815_s29 = smov [#allocation8]  }
  0x25   :  { %s47_s28 = sshll.u32 %s814_s26, 4  ;;  %s61_s30 = sshll.u32 %s815_s29, 4  ;;  %s48_s28 = int_to_ptr.vmem [resolvable:$true] %s47_s28  ;;  %s894_s30 = int_to_ptr.vmem [resolvable:$true] %s61_s30 }
  0x26   :  { %s736_s10 = scalar_lea.hbm %s958_s3, 2048 }
  0x27   :  { %p737_p2 = scmp.ne.s32.totalorder %s958_s3, %s736_s10  ;;  %p740_p3 = scmp.lt.u32.totalorder %s736_s10, %s958_s3 }
  0x29   :  { %p742_p4 = pnand %p740_p3, %p737_p2 }
  0x2b   :  { %745 = shalt.err (!%p742_p4)
}
  0x2c   :  { %s746_s0 = scalar_lea.vmem %s48_s28, 2048  ;;  %p751_p6 = scmp.lt.s32.totalorder %s48_s28, %s48_s28 }
  0x2d   :  { %p747_p5 = scmp.ne.s32.totalorder %s48_s28, %s746_s0  ;;  %p752_p7 = scmp.lt.s32.totalorder %s746_s0, %s746_s0 }
  0x2f   :  { %p753_p8 = por %p752_p7, %p751_p6 }
  0x31   :  { %p754_p9 = pnand %p753_p8, %p747_p5 }
  0x33   :  { %757 = shalt.err (!%p754_p9)
}
  0x34   :  { %53 = dma.hbm_to_vmem [thread:$0]  %s958_s3, 2048, %s48_s28, [#allocation6], %s812_s13, %s812_s13, %s813_s14  }
  0x35   :  { %s758_s20 = scalar_lea.hbm %s960_s5, 2048 }
  0x36   :  { %p759_p10 = scmp.ne.s32.totalorder %s960_s5, %s758_s20  ;;  %p762_p11 = scmp.lt.u32.totalorder %s758_s20, %s960_s5 }
  0x38   :  { %p764_p12 = pnand %p762_p11, %p759_p10 }
  0x3a   :  { %767 = shalt.err (!%p764_p12)
}
  0x3b   :  { %s768_s1 = scalar_lea.vmem %s894_s30, 2048  ;;  %p773_p0 = scmp.lt.s32.totalorder %s894_s30, %s894_s30 }
  0x3c   :  { %p769_p13 = scmp.ne.s32.totalorder %s894_s30, %s768_s1  ;;  %p774_p1 = scmp.lt.s32.totalorder %s768_s1, %s768_s1 }
  0x3e   :  { %p775_p2 = por %p774_p1, %p773_p0 }
  0x40   :  { %p776_p3 = pnand %p775_p2, %p769_p13 }
  0x42   :  { %779 = shalt.err (!%p776_p3)
}
  0x43   :  { %67 = dma.hbm_to_vmem [thread:$0]  %s960_s5, 2048, %s894_s30, [#allocation9], %s812_s13, %s812_s13, %s813_s14  }
  0x44   :  { %802 = dma.done.wait [#allocation3], 256  }
  0x45   :  { %803 = vsyncadd [#allocation3], 4294967040 }
  0x46   :  { %804 = dma.done.wait [#allocation6], 4096  }
  0x47   :  { %805 = vsyncadd [#allocation6], 4294963200 }
  0x48   :  { %806 = dma.done.wait [#allocation9], 2048  }
  0x49   :  { %807 = vsyncadd [#allocation9], 4294965248  ;;  %v84_v0 = vld [vmem:[#allocation5] sm:$0xff]  ;;  %v85_v1 = vld [vmem:[#allocation5 + $0x8] sm:$0xff]  ;;  %s816_s30 = smov [#allocation10]  }
  0x4a   :  { %v86_v2 = vld [vmem:[#allocation5 + $0x10] sm:$0xff]  ;;  %v581_v3 = vpack.c.bf16 %v85_v1, %v84_v0  ;;  %v87_v4 = vld [vmem:[#allocation5 + $0x18] sm:$0xff]  ;;  %v88_v6 = vld [vmem:[#allocation5 + $0x20] sm:$0xff]  ;;  %s405_s8 = sshll.u32 %s816_s30, 4  ;;  %s406_s8 = int_to_ptr.vmem [resolvable:$true] %s405_s8 }
  0x4b   :  { %v585_v5 = vpack.c.bf16 %v87_v4, %v86_v2  ;;  %v89_v7 = vld [vmem:[#allocation5 + $0x28] sm:$0xff]  ;;  %v90_v9 = vld [vmem:[#allocation5 + $0x30] sm:$0xff]  ;;  %v91_v10 = vld [vmem:[#allocation5 + $0x38] sm:$0xff]  ;;  %s780_s9 = scalar_lea.vmem %s406_s8, 256  ;;  %p785_p5 = scmp.lt.s32.totalorder %s406_s8, %s406_s8 }
  0x4c   :  { %582 = vmatprep.subr.bf16.mxu0 %v581_v3  ;;  %v589_v8 = vpack.c.bf16 %v89_v7, %v88_v6  ;;  %v82_v11 = vld [vmem:[#allocation2] sm:$0xff]  ;;  %v192_v12 = vld [vmem:[#allocation7] sm:$0xff]  ;;  %v193_v13 = vld [vmem:[#allocation7 + $0x8] sm:$0xff]  ;;  %v593_v20 = vpack.c.bf16 %v91_v10, %v90_v9  ;;  %p781_p4 = scmp.ne.s32.totalorder %s406_s8, %s780_s9  ;;  %p786_p6 = scmp.lt.s32.totalorder %s780_s9, %s780_s9 }
  0x4d   :  { %584 = vmatpush3.bf16.msra.mxu0 %v581_v3  ;;  %508 = vmatprep.mubr.f32.mxu0 %v82_v11  ;;  %v194_v14 = vld [vmem:[#allocation7 + $0x10] sm:$0xff]  ;;  %v613_v15 = vpack.c.bf16 %v193_v13, %v192_v12  ;;  %v195_v16 = vld [vmem:[#allocation7 + $0x18] sm:$0xff]  ;;  %v196_v18 = vld [vmem:[#allocation7 + $0x20] sm:$0xff] }
  0x4e   :  { %586 = vmatprep.subr.bf16.mxu0 %v585_v5  ;;  %v617_v17 = vpack.c.bf16 %v195_v16, %v194_v14  ;;  %v197_v19 = vld [vmem:[#allocation7 + $0x28] sm:$0xff]  ;;  %v92_v21 = vld [vmem:[#allocation5 + $0x40] sm:$0xff]  ;;  %v94_v25 = vld [vmem:[#allocation5 + $0x50] sm:$0xff]  ;;  %p787_p7 = por %p786_p6, %p785_p5 }
  0x4f   :  { %614 = vmatprep.subr.bf16.mxu1 %v613_v15  ;;  %v93_v22 = vld [vmem:[#allocation5 + $0x48] sm:$0xff]  ;;  %v621_v23 = vpack.c.bf16 %v197_v19, %v196_v18  ;;  %v95_v26 = vld [vmem:[#allocation5 + $0x58] sm:$0xff]  ;;  %v96_v28 = vld [vmem:[#allocation5 + $0x60] sm:$0xff] }
  0x50   :  { %616 = vmatpush3.bf16.msra.mxu1 %v613_v15  ;;  %v597_v24 = vpack.c.bf16 %v93_v22, %v92_v21  ;;  %v601_v27 = vpack.c.bf16 %v95_v26, %v94_v25  ;;  %v97_v29 = vld [vmem:[#allocation5 + $0x68] sm:$0xff]  ;;  %v98_v31 = vld [vmem:[#allocation5 + $0x70] sm:$0xff]  ;;  %v99_v32 = vld [vmem:[#allocation5 + $0x78] sm:$0xff]  ;;  %p788_p8 = pnand %p787_p7, %p781_p4 }
  0x51   :  { %588 = vmatpush3.bf16.msra.mxu0 %v585_v5  ;;  %618 = vmatprep.subr.bf16.mxu1 %v617_v17  ;;  %v605_v30 = vpack.c.bf16 %v97_v29, %v96_v28  ;;  %v609_v33 = vpack.c.bf16 %v99_v32, %v98_v31  ;;  %v83_v34 = vld [vmem:[#allocation2 + $0x8] sm:$0xff]  ;;  %v198_v35 = vld [vmem:[#allocation7 + $0x30] sm:$0xff]  ;;  %v200_v38 = vld [vmem:[#allocation7 + $0x40] sm:$0xff] }
  0x52   :  { %590 = vmatprep.subr.bf16.mxu0 %v589_v8  ;;  %v199_v36 = vld [vmem:[#allocation7 + $0x38] sm:$0xff]  ;;  %v201_v39 = vld [vmem:[#allocation7 + $0x48] sm:$0xff]  ;;  %v202_v41 = vld [vmem:[#allocation7 + $0x50] sm:$0xff] }
  0x53   :  { %v625_v37 = vpack.c.bf16 %v199_v36, %v198_v35  ;;  %v629_v40 = vpack.c.bf16 %v201_v39, %v200_v38  ;;  %v203_v42 = vld [vmem:[#allocation7 + $0x58] sm:$0xff]  ;;  %v204_v44 = vld [vmem:[#allocation7 + $0x60] sm:$0xff]  ;;  %v205_v45 = vld [vmem:[#allocation7 + $0x68] sm:$0xff] }
  0x54   :  { %620 = vmatpush3.bf16.msra.mxu1 %v617_v17  ;;  %v633_v43 = vpack.c.bf16 %v203_v42, %v202_v41  ;;  %v637_v46 = vpack.c.bf16 %v205_v45, %v204_v44  ;;  %v206_v47 = vld [vmem:[#allocation7 + $0x70] sm:$0xff]  ;;  %v207_v48 = vld [vmem:[#allocation7 + $0x78] sm:$0xff]  ;;  %v300_v50 = vld [vmem:[#allocation8] sm:$0xff] }
  0x55   :  { %592 = vmatpush3.bf16.msra.mxu0 %v589_v8  ;;  %622 = vmatprep.subr.bf16.mxu1 %v621_v23  ;;  %v641_v49 = vpack.c.bf16 %v207_v48, %v206_v47  ;;  %v301_v51 = vld [vmem:[#allocation8 + $0x8] sm:$0xff]  ;;  %v302_v52 = vld [vmem:[#allocation8 + $0x10] sm:$0xff]  ;;  %v303_v54 = vld [vmem:[#allocation8 + $0x18] sm:$0xff] }
  0x56   :  { %594 = vmatprep.subr.bf16.mxu0 %v593_v20  ;;  %v645_v53 = vpack.c.bf16 %v301_v51, %v300_v50  ;;  %v649_v55 = vpack.c.bf16 %v303_v54, %v302_v52  ;;  %v304_v56 = vld [vmem:[#allocation8 + $0x20] sm:$0xff]  ;;  %v305_v57 = vld [vmem:[#allocation8 + $0x28] sm:$0xff]  ;;  %v419_v59 = vld [vmem:[%s957_s2] ss:$0 sm:$0xff] }
  0x57   :  { %v653_v58 = vpack.c.bf16 %v305_v57, %v304_v56  ;;  %v306_v10 = vld [vmem:[#allocation8 + $0x30] sm:$0xff]  ;;  %v307_v11 = vld [vmem:[#allocation8 + $0x38] sm:$0xff]  ;;  %v308_v13 = vld [vmem:[#allocation8 + $0x40] sm:$0xff] }
  0x58   :  { %624 = vmatpush3.bf16.msra.mxu1 %v621_v23  ;;  %v657_v12 = vpack.c.bf16 %v307_v11, %v306_v10  ;;  %v309_v14 = vld [vmem:[#allocation8 + $0x48] sm:$0xff]  ;;  %v310_v16 = vld [vmem:[#allocation8 + $0x50] sm:$0xff]  ;;  %v311_v17 = vld [vmem:[#allocation8 + $0x58] sm:$0xff] }
  0x59   :  { %596 = vmatpush3.bf16.msra.mxu0 %v593_v20  ;;  %626 = vmatprep.subr.bf16.mxu1 %v625_v37  ;;  %v661_v15 = vpack.c.bf16 %v309_v14, %v308_v13  ;;  %v665_v18 = vpack.c.bf16 %v311_v17, %v310_v16  ;;  %v312_v19 = vld [vmem:[#allocation8 + $0x60] sm:$0xff]  ;;  %v313_v20 = vld [vmem:[#allocation8 + $0x68] sm:$0xff]  ;;  %v314_v22 = vld [vmem:[#allocation8 + $0x70] sm:$0xff] }
  0x5a   :  { %598 = vmatprep.subr.bf16.mxu0 %v597_v24  ;;  %v669_v21 = vpack.c.bf16 %v313_v20, %v312_v19  ;;  %v315_v23 = vld [vmem:[#allocation8 + $0x78] sm:$0xff]  ;;  %v420_v25 = vld [vmem:[%s959_s4] ss:$0 sm:$0xff] }
  0x5c   :  { %628 = vmatpush3.bf16.msra.mxu1 %v625_v37 }
  0x5d   :  { %600 = vmatpush3.bf16.msra.mxu0 %v597_v24  ;;  %630 = vmatprep.subr.bf16.mxu1 %v629_v40  ;;  %v673_v24 = vpack.c.bf16 %v315_v23, %v314_v22 }
  0x5e   :  { %602 = vmatprep.subr.bf16.mxu0 %v601_v27 }
  0x60   :  { %632 = vmatpush3.bf16.msra.mxu1 %v629_v40  ;;  %v421_v40 = vld [vmem:[%s961_s6] ss:$0 sm:$0xff] }
  0x61   :  { %604 = vmatpush3.bf16.msra.mxu0 %v601_v27  ;;  %634 = vmatprep.subr.bf16.mxu1 %v633_v43 }
  0x62   :  { %606 = vmatprep.subr.bf16.mxu0 %v605_v30 }
  0x64   :  { %636 = vmatpush3.bf16.msra.mxu1 %v633_v43 }
  0x65   :  { %608 = vmatpush3.bf16.msra.mxu0 %v605_v30  ;;  %638 = vmatprep.subr.bf16.mxu1 %v637_v46 }
  0x66   :  { %610 = vmatprep.subr.bf16.mxu0 %v609_v33 }
  0x68   :  { %640 = vmatpush3.bf16.msra.mxu1 %v637_v46 }
  0x69   :  { %612 = vmatpush3.bf16.msra.mxu0 %v609_v33  ;;  %642 = vmatprep.subr.bf16.mxu1 %v641_v49 }
  0x6a   :  { %646 = vmatprep.subr.bf16.mxu0 %v645_v53 }
  0x6c   :  { %509 = vmatmul.mubr.f32.vlgmr.msra.gmra.mrb[0].mxu0 %v83_v34  ;;  %644 = vmatpush3.bf16.msra.mxu1 %v641_v49 }
  0x6d   :  { %648 = vmatpush3.bf16.msra.mxu0 %v645_v53 }
  0x6e   :  { %650 = vmatprep.subr.bf16.mxu0 %v649_v55 }
  0x71   :  { %652 = vmatpush3.bf16.msra.mxu0 %v649_v55 }
  0x72   :  { %654 = vmatprep.subr.bf16.mxu0 %v653_v58 }
  0x75   :  { %656 = vmatpush3.bf16.msra.mxu0 %v653_v58 }
  0x76   :  { %658 = vmatprep.subr.bf16.mxu0 %v657_v12 }
  0x79   :  { %660 = vmatpush3.bf16.msra.mxu0 %v657_v12 }
  0x7a   :  { %662 = vmatprep.subr.bf16.mxu0 %v661_v15 }
  0x7d   :  { %664 = vmatpush3.bf16.msra.mxu0 %v661_v15 }
  0x7e   :  { %666 = vmatprep.subr.bf16.mxu0 %v665_v18 }
  0x81   :  { %668 = vmatpush3.bf16.msra.mxu0 %v665_v18 }
  0x82   :  { %670 = vmatprep.subr.bf16.mxu0 %v669_v21 }
  0x85   :  { %672 = vmatpush3.bf16.msra.mxu0 %v669_v21 }
  0x86   :  { %674 = vmatprep.subr.bf16.mxu0 %v673_v24 }
  0x89   :  { %676 = vmatpush3.bf16.msra.mxu0 %v673_v24 }
 0x13f   :  { %v510_v60 = vpop.f32.mrb[0].mxu0 }
 0x140   :  { %v179_v61 = vadd.f32 %v510_v60, %v419_v59  ;;  %v173_v62 = vpop.f32.mrb[1].mxu0 }
 0x141   :  { %v174_v63 = vadd.f32 %v419_v59, %v173_v62 }
 0x142   :  { %v185_v0 = vmul.f32 0.70710677, %v179_v61  ;;  %v183_v7 = vmul.f32 0.5, %v179_v61 }
 0x143   :  { %v184_v1 = vmul.f32 0.70710677, %v174_v63  ;;  %v182_v5 = vmul.f32 0.5, %v174_v63 }
 0x144   :  { %684 = verf.f32 %v185_v0 }
 0x145   :  { %686 = verf.f32 %v184_v1 }
 0x14e   :  { %v685_v2 = vpop.eup %684 }
 0x14f   :  { %v687_v3 = vpop.eup %686  ;;  %v189_v4 = vadd.f32 1.0, %v685_v2 }
 0x150   :  { %v188_v6 = vadd.f32 1.0, %v687_v3 }
 0x151   :  { %v191_v9 = vmul.f32 %v189_v4, %v183_v7 }
 0x152   :  { %v190_v8 = vmul.f32 %v188_v6, %v182_v5 }
 0x154   :  { %543 = vmatprep.mubr.f32.mxu1 %v190_v8 }
 0x155   :  { %544 = vmatmul.mubr.f32.vlgmr.msra.gmra.mrb[0].mxu1 %v191_v9 }
 0x228   :  { %v545_v26 = vpop.f32.mrb[0].mxu1 }
 0x229   :  { %v287_v27 = vadd.f32 %v545_v26, %v420_v25  ;;  %v281_v28 = vpop.f32.mrb[1].mxu1 }
 0x22a   :  { %v282_v29 = vadd.f32 %v420_v25, %v281_v28 }
 0x22b   :  { %v293_v30 = vmul.f32 0.70710677, %v287_v27  ;;  %v291_v37 = vmul.f32 0.5, %v287_v27 }
 0x22c   :  { %v292_v31 = vmul.f32 0.70710677, %v282_v29  ;;  %v290_v35 = vmul.f32 0.5, %v282_v29 }
 0x22d   :  { %688 = verf.f32 %v293_v30 }
 0x22e   :  { %690 = verf.f32 %v292_v31 }
 0x237   :  { %v689_v32 = vpop.eup %688 }
 0x238   :  { %v691_v33 = vpop.eup %690  ;;  %v297_v34 = vadd.f32 1.0, %v689_v32 }
 0x239   :  { %v296_v36 = vadd.f32 1.0, %v691_v33 }
 0x23a   :  { %v299_v39 = vmul.f32 %v297_v34, %v291_v37 }
 0x23b   :  { %v298_v38 = vmul.f32 %v296_v36, %v290_v35 }
 0x23d   :  { %578 = vmatprep.mubr.f32.mxu0 %v298_v38 }
 0x23e   :  { %579 = vmatmul.mubr.f32.vlgmr.msra.gmra.mrb[2].mxu0 %v299_v39 }
 0x311   :  { %v580_v41 = vpop.f32.mrb[2].mxu0 }
 0x312   :  { %v395_v42 = vadd.f32 %v580_v41, %v421_v40  ;;  %v389_v43 = vpop.f32.mrb[3].mxu0 }
 0x313   :  { %v390_v44 = vadd.f32 %v421_v40, %v389_v43 }
 0x314   :  { %399 = vst [vmem:[#allocation10 + $0x8] sm:$0xff] %v395_v42 }
 0x315   :  { %398 = vst [vmem:[#allocation10] sm:$0xff] %v390_v44 }
 0x316   :  { %791 = shalt.err (!%p788_p8)
}
 0x317   :  { %s792_s6 = scalar_lea.hbm %s962_s7, 256 }
 0x318   :  { %p793_p9 = scmp.ne.s32.totalorder %s962_s7, %s792_s6  ;;  %p796_p10 = scmp.lt.u32.totalorder %s792_s6, %s962_s7 }
 0x31a   :  { %p798_p11 = pnand %p796_p10, %p793_p9 }
 0x31c   :  { %801 = shalt.err (!%p798_p11)
}
 0x31d   :  { %411 = dma.vmem_to_hbm [thread:$0]  %s406_s8, 256, %s962_s7, [#allocation4], %s812_s13, %s812_s13, %s813_s14  }
 0x31e   :  { %808 = dma.done.wait [#allocation4], 256  }
 0x31f   :  { %809 = vsyncadd [#allocation4], 4294967040 }
 0x320   :  { %415 = vsyncpa [#allocation3], 1 }
 0x321   :  { %416 = vsyncpa [#allocation6], 1 }
 0x322   :  { %417 = vsyncpa [#allocation9], 1 }
 0x323   :  { %418 = vsyncpa [#allocation4], 1 }

</bundles_post_ra>
